<compile_context>
chip_gen: v7x
topology: tpu7x:2x2x1
jax: 0.10.0
libtpu: 0.0.40
codegen_flags: <defaults>
</compile_context>

<pallas_src>
import jax
import jax.numpy as jnp
from jax import lax
from jax.experimental import pallas as pl
from jax.experimental.pallas import tpu as pltpu

# nq == nv is assumed by the original module (it slices xd_trans with nv:)
NQ, NV, HID = 4, 4, 32
NX = NQ + NV
NSIM = 512          # simulation batch (lane axis), multiple of TILE
TILE = 256          # sims per grid step; grid=2 -> one step per TC on v7x
STEP = 0.15         # self.step in the module


def pds_kernel(x_ref, w1_ref, w1t_ref, bw_ref, out_ref):
    x = x_ref[...]              # (NX, TILE)   state, batch on lanes
    w1 = w1_ref[...]            # (HID, NX)
    w1t = w1t_ref[...]          # (NX, HID)    pre-transposed in the wrapper
    b1c = bw_ref[:, 0:1]        # (HID, 1)     packed [b1 | w2]
    w2c = bw_ref[:, 1:2]        # (HID, 1)

    # ---- value net gradient, analytic:  Vx^T = W1^T @ ((1 - tanh(z)^2) * w2)
    # Both contractions on the MXU (vector-extended slot, otherwise idle here).
    z = jnp.dot(w1, x, preferred_element_type=jnp.float32) + b1c    # (HID, TILE)
    t = jnp.tanh(z)                                                  # EUP
    dact = (1.0 - t * t) * w2c                                       # VPU
    vx = jnp.dot(w1t, dact, preferred_element_type=jnp.float32)      # (NX, TILE)

    # ---- project() : all reductions are cheap sublane reductions ----
    v = x[NQ:, :]                                                    # (NV, TILE)
    # xd = cat(v, 0)  =>  Vx . xd = <Vx[:NV], v>
    dot_vx_xd = jnp.sum(vx[:NV, :] * v, axis=0, keepdims=True)       # (1, TILE)
    # TODO(synk): loss_func is user-supplied in the original module; a
    # deterministic quadratic running cost sum(x^2) is used here.
    loss = jnp.sum(x * x, axis=0, keepdims=True)                     # (1, TILE)
    sq_norm = jnp.sum(vx * vx, axis=0, keepdims=True)                # (1, TILE)

    inv_norm = lax.rsqrt(sq_norm + 1e-6)                             # EUP rsqrt
    unnorm = jnp.maximum(dot_vx_xd + STEP * loss, 0.0)
    factor = (-5.0) * unnorm * inv_norm                              # (1, TILE)

    # ---- default dynamics: out = cat(v, a) built in registers, one full
    # lane-dense store per tile (no sublane-masked partial writes) ----
    a = vx[NV:, :] * factor                                          # (NV, TILE)
    out_ref[...] = jnp.concatenate([v, a], axis=0)                   # (NX, TILE)


def pack_params(w1, b1, w2):
    """Pre-layout the value-net parameters once (outside any rollout loop)."""
    w1t = w1.T                                           # (NX, HID)
    bw = jnp.concatenate([b1.T, w2.T], axis=1)           # (HID, 2) = [b1 | w2]
    return w1, w1t, bw


def pds_forward_lane_major(x_t, w1, w1t, bw, *, tile=TILE):
    """Core entry point: state in lane-major layout.

    x_t: (NX, nsim) float32  ->  (NX, nsim) float32
    Keep the state in this layout across integration steps to avoid per-call
    transposes (each one is an extra XLA op + HBM round trip).
    """
    nx, nsim = x_t.shape
    assert nx == NX
    tile = min(tile, nsim)
    assert tile % 128 == 0, "lane tile must be a multiple of 128"
    assert nsim % tile == 0, "nsim must be a multiple of the lane tile"

    const = lambda shape: pl.BlockSpec(shape, lambda i: (0, 0))
    return pl.pallas_call(
        pds_kernel,
        out_shape=jax.ShapeDtypeStruct((NX, nsim), jnp.float32),
        grid=(nsim // tile,),
        in_specs=[
            pl.BlockSpec((NX, tile), lambda i: (0, i)),   # x, tiled over sims
            const((HID, NX)),                             # w1   (VMEM resident)
            const((NX, HID)),                             # w1^T (VMEM resident)
            const((HID, 2)),                              # [b1 | w2]
        ],
        out_specs=pl.BlockSpec((NX, tile), lambda i: (0, i)),
        compiler_params=pltpu.CompilerParams(
            dimension_semantics=("parallel",),            # v7x: 2 TCs share grid
            vmem_limit_bytes=32 * 1024 * 1024),
    )(x_t, w1, w1t, bw)


def projected_dynamical_system(x, w1, b1, w2, *, tile=TILE):
    """PyTorch-shape convenience wrapper: x (nsim, 1, nx) -> (nsim, 1, nx).

    For production rollouts prefer pds_forward_lane_major + pack_params and
    keep the state in (NX, nsim) layout between steps (skips both transposes).
    """
    nsim = x.shape[0]
    assert NQ == NV, "module semantics (xd_trans[..., nv:]) require nq == nv"
    assert x.shape == (nsim, 1, NX)

    x_t = x.reshape(nsim, NX).T                           # (NX, nsim)
    w1_, w1t, bw = pack_params(w1, b1, w2)
    out_t = pds_forward_lane_major(x_t, w1_, w1t, bw, tile=tile)
    return out_t.T.reshape(nsim, 1, NX)


def reference(x, w1, b1, w2):
    """Pure-JAX mirror of the torch forward pass (sqrt + divide formulation)."""
    nsim = x.shape[0]
    x2d = x.reshape(nsim, NX)
    z = x2d @ w1.T + b1
    t = jnp.tanh(z)
    vx = ((1.0 - t * t) * w2) @ w1
    v = x2d[:, NQ:]
    dot_vx_xd = jnp.sum(vx[:, :NV] * v, axis=-1, keepdims=True)
    loss = jnp.sum(x2d * x2d, axis=-1, keepdims=True)
    norm = jnp.sqrt(jnp.sum(vx * vx, axis=-1, keepdims=True) + 1e-6)
    unnorm = jnp.maximum(dot_vx_xd + STEP * loss, 0.0)
    xd_trans = -(vx / norm) * unnorm * 5.0
    a = xd_trans[:, NV:]
    return jnp.concatenate([v, a], axis=-1).reshape(nsim, 1, NX)


if __name__ == "__main__":
    key = jax.random.PRNGKey(0)
    kx, k1, k2, k3 = jax.random.split(key, 4)

    # deterministic parameters for the synthetic value network
    w1 = 0.3 * jax.random.normal(k1, (HID, NX), dtype=jnp.float32)
    b1 = 0.1 * jax.random.normal(k2, (1, HID), dtype=jnp.float32)
    w2 = 0.3 * jax.random.normal(k3, (1, HID), dtype=jnp.float32)

    # state x = [q, v] per simulation, PyTorch shape convention (nsim, 1, nx)
    x = jax.random.normal(kx, (NSIM, 1, NX), dtype=jnp.float32)

    out = jax.block_until_ready(projected_dynamical_system(x, w1, b1, w2))
    ref = reference(x, w1, b1, w2)

    assert out.shape == (NSIM, 1, NX)
    # tolerance slightly relaxed vs 1e-5 to allow for the EUP rsqrt path
    # (reference uses sqrt + divide, identical math).
    assert jnp.allclose(out, ref, atol=1e-4, rtol=1e-3), "mismatch vs reference"

    print("KERNEL_OK")
</pallas_src>

<mosaic_0001>
module attributes {stable_mosaic.version = 11 : i64} {
  func.func @pds_kernel(%arg0: i32, %arg1: memref<8x256xf32, #tpu.memory_space<vmem>>, %arg2: memref<32x8xf32, #tpu.memory_space<vmem>>, %arg3: memref<8x32xf32, #tpu.memory_space<vmem>>, %arg4: memref<32x2xf32, #tpu.memory_space<vmem>>, %arg5: memref<8x256xf32, #tpu.memory_space<vmem>>) attributes {dimension_semantics = [#tpu.dimension_semantics<parallel>], iteration_bounds = array<i64: 2>, scalar_prefetch = 0 : i64, scratch_operands = 0 : i64, tpu.core_type = #tpu.core_type<tc>, window_params = [{transform_indices = @transform_0, window_bounds = array<i64: 8, 256>}, {pipeline_mode = #tpu.pipeline_mode<synchronous>, transform_indices = @transform_1, window_bounds = array<i64: 32, 8>}, {pipeline_mode = #tpu.pipeline_mode<synchronous>, transform_indices = @transform_2, window_bounds = array<i64: 8, 32>}, {pipeline_mode = #tpu.pipeline_mode<synchronous>, transform_indices = @transform_3, window_bounds = array<i64: 32, 2>}, {transform_indices = @transform_4, window_bounds = array<i64: 8, 256>}]} {
    %c0 = arith.constant 0 : index
    %c0_0 = arith.constant 0 : index
    %0 = vector.load %arg1[%c0, %c0_0] : memref<8x256xf32, #tpu.memory_space<vmem>>, vector<8x256xf32>
    %c0_1 = arith.constant 0 : index
    %c0_2 = arith.constant 0 : index
    %1 = vector.load %arg2[%c0_1, %c0_2] : memref<32x8xf32, #tpu.memory_space<vmem>>, vector<32x8xf32>
    %c0_3 = arith.constant 0 : index
    %c0_4 = arith.constant 0 : index
    %2 = vector.load %arg3[%c0_3, %c0_4] : memref<8x32xf32, #tpu.memory_space<vmem>>, vector<8x32xf32>
    %c0_5 = arith.constant 0 : index
    %c0_6 = arith.constant 0 : index
    %3 = vector.load %arg4[%c0_5, %c0_6] : memref<32x2xf32, #tpu.memory_space<vmem>>, vector<32x1xf32>
    %c0_7 = arith.constant 0 : index
    %c1 = arith.constant 1 : index
    %4 = vector.load %arg4[%c0_7, %c1] : memref<32x2xf32, #tpu.memory_space<vmem>>, vector<32x1xf32>
    %cst = arith.constant dense<0.000000e+00> : vector<32x256xf32>
    %5 = tpu.matmul %1, %0, %cst {dimension_numbers = #tpu.dot_dimension_numbers<[1], [0], [0], [1], [0, 0, 1, 1], [], []>} : vector<32x8xf32>, vector<8x256xf32>, vector<32x256xf32> -> vector<32x256xf32>
    %6 = vector.broadcast %3 : vector<32x1xf32> to vector<32x256xf32>
    %7 = arith.addf %5, %6 : vector<32x256xf32>
    %8 = math.tanh %7 : vector<32x256xf32>
    %9 = arith.mulf %8, %8 : vector<32x256xf32>
    %cst_8 = arith.constant 1.000000e+00 : f32
    %10 = vector.broadcast %cst_8 : f32 to vector<32x256xf32>
    %11 = arith.subf %10, %9 : vector<32x256xf32>
    %12 = vector.broadcast %4 : vector<32x1xf32> to vector<32x256xf32>
    %13 = arith.mulf %11, %12 : vector<32x256xf32>
    %cst_9 = arith.constant dense<0.000000e+00> : vector<8x256xf32>
    %14 = tpu.matmul %2, %13, %cst_9 {dimension_numbers = #tpu.dot_dimension_numbers<[1], [0], [0], [1], [0, 0, 1, 1], [], []>} : vector<8x32xf32>, vector<32x256xf32>, vector<8x256xf32> -> vector<8x256xf32>
    %15 = vector.extract_strided_slice %0 {offsets = [4, 0], sizes = [4, 256], strides = [1, 1]} : vector<8x256xf32> to vector<4x256xf32>
    %16 = vector.extract_strided_slice %14 {offsets = [0, 0], sizes = [4, 256], strides = [1, 1]} : vector<8x256xf32> to vector<4x256xf32>
    %17 = arith.mulf %16, %15 : vector<4x256xf32>
    %cst_10 = arith.constant dense<0.000000e+00> : vector<256xf32>
    %18 = vector.multi_reduction <add>, %17, %cst_10 [0] : vector<4x256xf32> to vector<256xf32>
    %19 = vector.shape_cast %18 : vector<256xf32> to vector<1x256xf32>
    %20 = arith.mulf %0, %0 : vector<8x256xf32>
    %cst_11 = arith.constant dense<0.000000e+00> : vector<256xf32>
    %21 = vector.multi_reduction <add>, %20, %cst_11 [0] : vector<8x256xf32> to vector<256xf32>
    %22 = vector.shape_cast %21 : vector<256xf32> to vector<1x256xf32>
    %23 = arith.mulf %14, %14 : vector<8x256xf32>
    %cst_12 = arith.constant dense<0.000000e+00> : vector<256xf32>
    %24 = vector.multi_reduction <add>, %23, %cst_12 [0] : vector<8x256xf32> to vector<256xf32>
    %25 = vector.shape_cast %24 : vector<256xf32> to vector<1x256xf32>
    %cst_13 = arith.constant 9.99999997E-7 : f32
    %26 = vector.broadcast %cst_13 : f32 to vector<1x256xf32>
    %27 = arith.addf %25, %26 : vector<1x256xf32>
    %28 = math.rsqrt %27 : vector<1x256xf32>
    %cst_14 = arith.constant 1.500000e-01 : f32
    %29 = vector.broadcast %cst_14 : f32 to vector<1x256xf32>
    %30 = arith.mulf %29, %22 : vector<1x256xf32>
    %31 = arith.addf %19, %30 : vector<1x256xf32>
    %cst_15 = arith.constant 0.000000e+00 : f32
    %32 = vector.broadcast %cst_15 : f32 to vector<1x256xf32>
    %33 = arith.maximumf %31, %32 : vector<1x256xf32>
    %cst_16 = arith.constant -5.000000e+00 : f32
    %34 = vector.broadcast %cst_16 : f32 to vector<1x256xf32>
    %35 = arith.mulf %34, %33 : vector<1x256xf32>
    %36 = arith.mulf %35, %28 : vector<1x256xf32>
    %37 = vector.extract_strided_slice %14 {offsets = [4, 0], sizes = [4, 256], strides = [1, 1]} : vector<8x256xf32> to vector<4x256xf32>
    %38 = vector.broadcast %36 : vector<1x256xf32> to vector<4x256xf32>
    %39 = arith.mulf %37, %38 : vector<4x256xf32>
    %40 = tpu.concatenate %15, %39 in 0 : vector<4x256xf32>, vector<4x256xf32> -> vector<8x256xf32>
    %c0_17 = arith.constant 0 : index
    %c0_18 = arith.constant 0 : index
    %41 = vector.load %arg5[%c0_17, %c0_18] : memref<8x256xf32, #tpu.memory_space<vmem>>, vector<8x256xf32>
    tpu.vector_store %arg5[%c0_17, %c0_18], %40 {strides = array<i32>} : memref<8x256xf32, #tpu.memory_space<vmem>>, vector<8x256xf32>,
    return
  }
  func.func @transform_0(%arg0: i32) -> (i32, i32) {
    %c0_i32 = arith.constant 0 : i32
    %c0_i32_0 = arith.constant 0 : i32
    return %c0_i32, %arg0 : i32, i32
  }
  func.func @transform_1(%arg0: i32) -> (i32, i32) {
    %c0_i32 = arith.constant 0 : i32
    %c0_i32_0 = arith.constant 0 : i32
    %c0_i32_1 = arith.constant 0 : i32
    return %c0_i32, %c0_i32_0 : i32, i32
  }
  func.func @transform_2(%arg0: i32) -> (i32, i32) {
    %c0_i32 = arith.constant 0 : i32
    %c0_i32_0 = arith.constant 0 : i32
    %c0_i32_1 = arith.constant 0 : i32
    return %c0_i32, %c0_i32_0 : i32, i32
  }
  func.func @transform_3(%arg0: i32) -> (i32, i32) {
    %c0_i32 = arith.constant 0 : i32
    %c0_i32_0 = arith.constant 0 : i32
    %c0_i32_1 = arith.constant 0 : i32
    return %c0_i32, %c0_i32_0 : i32, i32
  }
  func.func @transform_4(%arg0: i32) -> (i32, i32) {
    %c0_i32 = arith.constant 0 : i32
    %c0_i32_0 = arith.constant 0 : i32
    return %c0_i32, %arg0 : i32, i32
  }
}

</mosaic_0001>

<bundles_post_ra>
// kernel: tpu_custom_call.1
= control target key start
LH: loop header
LB: loop body
LE: loop exit
PB: predicated region body
PF: predicated region fallthrough
CT: control target
= control target key end

     0   :  { %9 = vsyncpa [#allocation3], 0  ;;  %s939_s0 = inlined_call_operand.vmem [shape: f32[8,512], index: 0, kind: input, shape index: {}]   ;;  %s940_s1 = inlined_call_operand.vmem [shape: f32[32,8], index: 1, kind: input, shape index: {}]   ;;  %s941_s2 = inlined_call_operand.vmem [shape: f32[8,32], index: 2, kind: input, shape index: {}]   ;;  %s942_s3 = inlined_call_operand.vmem [shape: f32[32,2], index: 3, kind: input, shape index: {}]   ;;  %s943_s4 = inlined_call_operand.hbm [shape: f32[8,512], index: 4, kind: output, shape index: {}]  }
   0x1   :  { %11 = vsyncpa [#allocation3 + $0x1], 0  ;;  %s785_s15 = smov 0   ;;  %s787_s16 = smov 0  }
   0x2   :  { %s789_s17 = smov 0   ;;  %s791_s18 = smov 0  }
   0x3 LB: > { %s806_s19 = sadd.s32 4294967295, %s754_s18   ;;  %s600_s20 = sadd.s32 4294967294, %s754_s18   ;;  %s754_s18 = sphi %s791_s18, %s949_s18   ;;  %s750_s17 = sphi %s789_s17, %s948_s17   ;;  %s746_s16 = sphi %s787_s16, %s947_s16   ;;  %s742_s15 = sphi %s785_s15, %s946_s15  }
   0x4   : > { %s810_s21 = sadd.s32 1, %s754_s18   ;;  %s113_s22 = sadd.s32 1, %s750_s17 }
   0x5   : > { %s110_s23 = ssub.s32 %s754_s18, %s810_s21  ;;  %p123_p0 = scmp.ne.s32.totalorder %s750_s17, %s746_s16 }
   0x6   : > { %p111_p1 = scmp.eq.s32.totalorder %s110_s23, 0  ;;  %p124_p2 = scmp.eq.s32.totalorder %s806_s19, 1 }
   0x7   : > { %p129_p3 = scmp.ne.s32.totalorder %s746_s16, %s742_s15  ;;  %p130_p4 = scmp.eq.s32.totalorder %s600_s20, 1 }
   0x8   : > { %s821_s24 = scalar_select %p111_p1, %s750_s17, %s113_s22  }
   0x9   : > { %p823_p5 = por %p124_p2, %p123_p0  ;;  %p827_p6 = por %p130_p4, %p129_p3 }
   0xa   : > { %p603_p7 = scmp.ge.s32.totalorder %s754_s18, 1  ;;  %p166_p8 = scmp.lt.s32.totalorder %s754_s18, 3 }
   0xc   : > { %p167_p9 = pnand %p603_p7, %p166_p8 }
   0xd   : > { %s605_s27 = sshll.u32 (!%p167_p9), %s806_s19, 1  ;;  %v756_v0 = vmov (!%p167_p9), 0.0   ;;  %v206_v1 = vld [vmem:[%s942_s3] sm:$0xff] (!%p167_p9)  ;;  %v757_v2 = vmov (!%p167_p9), 0   ;;  %v208_v3 = vld [vmem:[%s942_s3 + $0x10] sm:$0xff] (!%p167_p9)  ;;  %v207_v4 = vld [vmem:[%s942_s3 + $0x8] sm:$0xff] (!%p167_p9) }
   0xe   : > { %170 = sbr.rel (%p167_p9) target bundleno = 536 (0x218), region = 36  ;;  %p193_p10 = scmp.lt.s32.totalorder (!%p167_p9), %s605_s27, 3  ;;  %307 = vmatprep.mubr.f32.mxu0 (!%p167_p9), %v756_v0  ;;  %448 = vmatprep.mubr.f32.mxu1 (!%p167_p9), %v756_v0  ;;  %v209_v5 = vld [vmem:[%s942_s3 + $0x18] sm:$0xff] (!%p167_p9)  ;;  %v201_v8 = vld [vmem:[%s940_s1] sm:$0xff] (!%p167_p9)  ;;  %vm230_vm0 = vcmask (!%p167_p9), 64512   ;;  %v202_v9 = vld [vmem:[%s940_s1 + $0x8] sm:$0xff] (!%p167_p9) }
   0xf   : > { %668 = vset.pattern.permute.xlu0 (!%p167_p9), %v757_v2  ;;  %669 = vset.pattern.permute.xlu1 (!%p167_p9), %v757_v2  ;;  %v758_v10 = vmov (!%p167_p9), 1   ;;  %v203_v11 = vld [vmem:[%s940_s1 + $0x10] sm:$0xff] (!%p167_p9)  ;;  %v204_v12 = vld [vmem:[%s940_s1 + $0x18] sm:$0xff] (!%p167_p9)  ;;  %vm380_vm1 = vcmask (!%p167_p9), 261120   ;;  %vm463_vm2 = vcmask (!%p167_p9), 1043456   ;;  %s189_s7 = sand.u32 (!%p167_p9), 1, %s746_s16  }
  0x10   : > { %212 = vperm.xlu0 (!%p167_p9), %668, %v206_v1   ;;  %222 = vperm.xlu1 (!%p167_p9), %669, %v208_v3   ;;  %s604_s8 = sshll.u32 (!%p167_p9), %s189_s7, 4  ;;  %s617_s9 = sshll.u32 (!%p167_p9), %s806_s19, 8 }
  0x11   : > { %s894_s14 = scalar_lea.hbm (!%p167_p9), %s943_s4, %s617_s9  ;;  %s527_s19 = scalar_lea.sflag (!%p167_p9), [#allocation3], %s189_s7 }
  0x12   : > { %s759_s22 = smov (!%p167_p9), [#allocation2]  }
  0x13   : > { %s696_s23 = sshll.u32 (!%p167_p9), %s759_s22, 4  ;;  %s697_s23 = int_to_ptr.vmem [resolvable:$false] %s696_s23 }
  0x14   : > { %217 = vperm.xlu0 (!%p167_p9), %668, %v207_v4   ;;  %227 = vperm.xlu1 (!%p167_p9), %669, %v209_v5  }
  0x15   : > { %s951_s27 = smov (!%p193_p10, %s605_s27), 3 }
  0x16   : > { %s606_s10 = sshll.u32 %s951_s27, 3  ;;  %s698_s27 = scalar_lea.vmem %s697_s23, 512 }
  0x17   : > { %s196_s13 = scalar_lea.vmem %s939_s0, %s606_s10  ;;  %s191_s10 = scalar_lea.vmem [#allocation2], %s604_s8 }
  0x18   : > { %v849_v6 = vld [vmem:[%s196_s13 + $0x8] sm:$0xff]  ;;  %v851_v7 = vld [vmem:[%s196_s13] sm:$0xff]  ;;  %670 = vset.pattern.permute.xlu0 %v758_v10  ;;  %671 = vset.pattern.permute.xlu1 %v758_v10  ;;  %s541_s11 = sshll.u32 %s191_s10, 4  ;;  %s896_s11 = int_to_ptr.vmem [resolvable:$true] %s541_s11 }
  0x19   : > { %243 = vmatprep.subr.mxu0 %v849_v6  ;;  %357 = vperm.xlu0 %670, %v206_v1   ;;  %s692_s20 = scalar_lea.vmem %s896_s11, 256  ;;  %p699_p0 = scmp.lt.s32.totalorder %s896_s11, %s697_s23 }
  0x1a   : > { %244 = vmatpush1.msra.mxu0 %v851_v7  ;;  %361 = vperm.xlu1 %671, %v207_v4   ;;  %p693_p11 = scmp.ne.s32.totalorder %s896_s11, %s692_s20  ;;  %p700_p1 = scmp.lt.s32.totalorder %s698_s27, %s692_s20 }
  0x1b   : > { %607 = vmatmul.mubr.msk.f32.vlgmr.msra.gmra.mrb[0].mxu0 %vm230_vm0, %v201_v8 }
  0x1c   : > { %313 = vmatprep.mubr.f32.mxu0 %v756_v0  ;;  %p694_p12 = pnand %p693_p11, %p823_p5  ;;  %p701_p2 = por %p700_p1, %p699_p0 }
  0x1d   : > { %369 = vperm.xlu0 %670, %v209_v5  }
  0x1e   : > { %365 = vperm.xlu1 %671, %v208_v3   ;;  %p695_p13 = pneg %p694_p12 }
  0x1f   : > { %608 = vmatmul.mubr.msk.f32.gmra.mrb[2].mxu0 %vm230_vm0, %v202_v9 }
  0x20   : > { %319 = vmatprep.mubr.f32.mxu0 %v756_v0  ;;  %p702_p3 = pnand %p701_p2, %p695_p13 }
  0x23   : > { %609 = vmatmul.mubr.msk.f32.gmra.mrb[4].mxu0 %vm230_vm0, %v203_v11  ;;  %v205_v11 = vld [vmem:[%s941_s2] sm:$0xff] }
  0x24   : > { %325 = vmatprep.mubr.f32.mxu0 %v756_v0 }
  0x27   : > { %610 = vmatmul.mubr.msk.f32.gmra.mrb[6].mxu0 %vm230_vm0, %v204_v12  ;;  %v478_v12 = vmul.f32 %v851_v7, %v851_v7 }
  0x8f   : > { %v213_v13 = vpop.permute.xlu0 %212  ;;  %v223_v22 = vpop.permute.xlu1 %222 }
  0x93   : > { %v218_v18 = vpop.permute.xlu0 %217  ;;  %v228_v28 = vpop.permute.xlu1 %227 }
  0x98   : > { %v358_v42 = vpop.permute.xlu0 %357 }
  0x99   : > { %v362_v44 = vpop.permute.xlu1 %361 }
  0x9c   : > { %v370_v1 = vpop.permute.xlu0 %369 }
  0x9d   : > { %v366_v61 = vpop.permute.xlu1 %365 }
  0xee   : > { %v309_v14 = vpop.f32.mrb[0].mxu0 }
  0xef   : > { %v310_v15 = vadd.f32 %v309_v14, %v213_v13  ;;  %v311_v16 = vpop.f32.mrb[1].mxu0  ;;  %v480_v14 = vrot.slane %v478_v12, 4 }
  0xf0   : > { %v312_v17 = vadd.f32 %v311_v16, %v213_v13  ;;  %v479_v13 = vmul.f32 %v849_v6, %v849_v6 }
  0xf1   : > { %672 = vtanh.f32 %v310_v15  ;;  %v481_v16 = vadd.f32 %v480_v14, %v478_v12 }
  0xf2   : > { %674 = vtanh.f32 %v312_v17  ;;  %v315_v19 = vpop.f32.mrb[2].mxu0  ;;  %v486_v15 = vrot.slane %v479_v13, 4 }
  0xf3   : > { %v316_v20 = vadd.f32 %v315_v19, %v218_v18  ;;  %v317_v21 = vpop.f32.mrb[3].mxu0  ;;  %v457_v19 = vrot.slane %v851_v7, 4 }
  0xf4   : > { %v318_v23 = vadd.f32 %v317_v21, %v218_v18  ;;  %v487_v17 = vadd.f32 %v486_v15, %v479_v13  ;;  %v482_v18 = vrot.slane %v481_v16, 2 }
  0xf5   : > { %676 = vtanh.f32 %v316_v20  ;;  %v458_v20 = vrot.slane %v849_v6, 4 }
  0xf6   : > { %678 = vtanh.f32 %v318_v23  ;;  %v321_v24 = vpop.f32.mrb[4].mxu0  ;;  %v488_v21 = vrot.slane %v487_v17, 2 }
  0xf7   : > { %v322_v25 = vadd.f32 %v321_v24, %v223_v22  ;;  %v323_v26 = vpop.f32.mrb[5].mxu0 }
  0xf8   : > { %v324_v27 = vadd.f32 %v323_v26, %v223_v22  ;;  %v483_v22 = vadd.f32 %v482_v18, %v481_v16 }
  0xf9   : > { %680 = vtanh.f32 %v322_v25 }
  0xfa   : > { %682 = vtanh.f32 %v324_v27  ;;  %v327_v29 = vpop.f32.mrb[6].mxu0 }
  0xfb   : > { %v673_v30 = vpop.eup %672  ;;  %v328_v31 = vadd.f32 %v327_v29, %v228_v28  ;;  %v329_v32 = vpop.f32.mrb[7].mxu0  ;;  %v489_v29 = vadd.f32 %v488_v21, %v487_v17 }
  0xfc   : > { %v675_v33 = vpop.eup %674  ;;  %v340_v34 = vmul.f32 %v673_v30, %v673_v30  ;;  %v330_v35 = vadd.f32 %v329_v32, %v228_v28  ;;  %v484_v32 = vrot.slane %v483_v22, 1 }
  0xfd   : > { %v341_v36 = vmul.f32 %v675_v33, %v675_v33  ;;  %684 = vtanh.f32 %v328_v31 }
  0xfe   : > { %686 = vtanh.f32 %v330_v35  ;;  %v348_v40 = vsub.f32 1.0, %v340_v34 }
  0xff   : > { %v677_v37 = vpop.eup %676  ;;  %v349_v43 = vsub.f32 1.0, %v341_v36 }
 0x100   : > { %v679_v38 = vpop.eup %678  ;;  %v342_v39 = vmul.f32 %v677_v37, %v677_v37  ;;  %v372_v49 = vmul.f32 %v358_v42, %v348_v40  ;;  %v490_v40 = vrot.slane %v489_v29, 1 }
 0x101   : > { %v343_v41 = vmul.f32 %v679_v38, %v679_v38  ;;  %v373_v52 = vmul.f32 %v358_v42, %v349_v43  ;;  %v485_v43 = vadd.f32 %v484_v32, %v483_v22 }
 0x102   : > { %v350_v45 = vsub.f32 1.0, %v342_v39 }
 0x103   : > { %v681_v46 = vpop.eup %680  ;;  %v351_v47 = vsub.f32 1.0, %v343_v41 }
 0x104   : > { %v683_v48 = vpop.eup %682  ;;  %v374_v50 = vmul.f32 %v362_v44, %v350_v45  ;;  %v344_v51 = vmul.f32 %v681_v46, %v681_v46 }
 0x105   : > { %v375_v53 = vmul.f32 %v362_v44, %v351_v47  ;;  %v345_v54 = vmul.f32 %v683_v48, %v683_v48 }
 0x106   : > { %v620_v55 = vpack.c.bf16 %v374_v50, %v372_v49  ;;  %v352_v59 = vsub.f32 1.0, %v344_v51 }
 0x107   : > { %v685_v56 = vpop.eup %684  ;;  %v618_v57 = vpack.c.bf16 %v375_v53, %v373_v52  ;;  %v353_v62 = vsub.f32 1.0, %v345_v54  ;;  %v491_v52 = vadd.f32 %v490_v40, %v489_v29  ;;  %v510_v54 = vmul.f32 0.15, %v485_v43 }
 0x108   : > { %v687_v58 = vpop.eup %686  ;;  %v346_v60 = vmul.f32 %v685_v56, %v685_v56  ;;  %v376_v3 = vmul.f32 %v366_v61, %v352_v59 }
 0x109   : > { %v347_v63 = vmul.f32 %v687_v58, %v687_v58  ;;  %619 = vmatprep.subr.bf16.mxu1 %v618_v57  ;;  %v377_v5 = vmul.f32 %v366_v61, %v353_v62  ;;  %v511_v62 = vmul.f32 0.15, %v491_v52 }
 0x10a   : > { %v354_v0 = vsub.f32 1.0, %v346_v60  ;;  %621 = vmatpush1.bf16.msra.mxu1 %v620_v55 }
 0x10b   : > { %v355_v2 = vsub.f32 1.0, %v347_v63 }
 0x10c   : > { %v378_v4 = vmul.f32 %v370_v1, %v354_v0 }
 0x10d   : > { %v379_v8 = vmul.f32 %v370_v1, %v355_v2 }
 0x10e   : > { %v624_v9 = vpack.c.bf16 %v378_v4, %v376_v3 }
 0x10f   : > { %v622_v10 = vpack.c.bf16 %v379_v8, %v377_v5 }
 0x111   : > { %623 = vmatprep.subr.bf16.mxu1 %v622_v10 }
 0x112   : > { %625 = vmatpush1.bf16.msra.mxu1 %v624_v9 }
 0x115   : > { %611 = vmatmul.mubr.msk.f32.vlgmr.msra.gmra.mrb[0].mxu1 %vm380_vm1, %v205_v11 }
 0x1e8   : > { %v450_v23 = vpop.f32.mrb[0].mxu1 }
 0x1e9   : > { %v461_v24 = vmul.f32 %v457_v19, %v450_v23  ;;  %v492_v25 = vmul.f32 %v450_v23, %v450_v23  ;;  %v452_v26 = vpop.f32.mrb[1].mxu1 }
 0x1ea   : > { %v462_v27 = vmul.f32 %v458_v20, %v452_v26  ;;  %v493_v28 = vmul.f32 %v452_v26, %v452_v26 }
 0x1eb   : > { %v464_v30 = vsel %vm463_vm2, %v461_v24, 0.0  ;;  %v494_v31 = vrot.slane %v492_v25, 4 }
 0x1ec   : > { %v465_v33 = vrot.slane %v464_v30, 4  ;;  %v471_v34 = vsel %vm463_vm2, %v462_v27, 0.0  ;;  %v500_v35 = vrot.slane %v493_v28, 4 }
 0x1ed   : > { %v495_v36 = vadd.f32 %v494_v31, %v492_v25  ;;  %v472_v37 = vrot.slane %v471_v34, 4 }
 0x1ee   : > { %v466_v38 = vadd.f32 %v465_v33, %v464_v30  ;;  %v501_v39 = vadd.f32 %v500_v35, %v493_v28 }
 0x1ef   : > { %v496_v41 = vrot.slane %v495_v36, 2  ;;  %v473_v42 = vadd.f32 %v472_v37, %v471_v34 }
 0x1f0   : > { %v467_v44 = vrot.slane %v466_v38, 2  ;;  %v502_v45 = vrot.slane %v501_v39, 2 }
 0x1f1   : > { %v497_v46 = vadd.f32 %v496_v41, %v495_v36  ;;  %v474_v47 = vrot.slane %v473_v42, 2 }
 0x1f2   : > { %v468_v48 = vadd.f32 %v467_v44, %v466_v38  ;;  %v503_v49 = vadd.f32 %v502_v45, %v501_v39 }
 0x1f3   : > { %v498_v50 = vrot.slane %v497_v46, 1  ;;  %v475_v51 = vadd.f32 %v474_v47, %v473_v42 }
 0x1f4   : > { %v469_v53 = vrot.slane %v468_v48, 1  ;;  %v504_v55 = vrot.slane %v503_v49, 1 }
 0x1f5   : > { %v499_v56 = vadd.f32 %v498_v50, %v497_v46  ;;  %v476_v57 = vrot.slane %v475_v51, 1 }
 0x1f6   : > { %v470_v58 = vadd.f32 %v469_v53, %v468_v48  ;;  %v505_v59 = vadd.f32 %v504_v55, %v503_v49 }
 0x1f7   : > { %v506_v60 = vadd.f32 1e-06, %v499_v56  ;;  %v477_v61 = vadd.f32 %v476_v57, %v475_v51 }
 0x1f8   : > { %v512_v63 = vadd.f32 %v510_v54, %v470_v58  ;;  %v507_v0 = vadd.f32 1e-06, %v505_v59 }
 0x1f9   : > { %688 = vrsqrt.f32 %v506_v60  ;;  %v513_v1 = vadd.f32 %v511_v62, %v477_v61 }
 0x1fa   : > { %690 = vrsqrt.f32 %v507_v0  ;;  %v514_v2 = vmax.f32 %v512_v63, 0.0 }
 0x1fb   : > { %v515_v3 = vmax.f32 %v513_v1, 0.0 }
 0x1fc   : > { %v516_v4 = vmul.f32 -5.0, %v514_v2 }
 0x1fd   : > { %v517_v8 = vmul.f32 -5.0, %v515_v3 }
 0x203   : > { %v689_v5 = vpop.eup %688 }
 0x204   : > { %v691_v9 = vpop.eup %690  ;;  %v518_v10 = vmul.f32 %v689_v5, %v516_v4 }
 0x205   : > { %v519_v11 = vmul.f32 %v691_v9, %v517_v8 }
 0x206   : > { %v520_v12 = vmul.f32 %v518_v10, %v450_v23 }
 0x207   : > { %v521_v13 = vmul.f32 %v519_v11, %v452_v26 }
 0x208   : > { %v522_v14 = vsel %vm463_vm2, %v457_v19, %v520_v12 }
 0x209   : > { %v523_v15 = vsel %vm463_vm2, %v458_v20, %v521_v13  ;;  %524 = vst [vmem:[%s191_s10] sm:$0xff] %v522_v14 }
 0x20a   : > { %525 = vst [vmem:[%s191_s10 + $0x8] sm:$0xff] %v523_v15 }
 0x20b   : > { %705 = shalt.err (!%p702_p3)
}
 0x20c   : > { %s706_s28 = scalar_lea.hbm %s894_s14, 256  ;;  %s710_s5 = scalar_lea.hbm %s943_s4, 512 }
 0x20d   : > { %p707_p4 = scmp.ne.s32.totalorder %s894_s14, %s706_s28  ;;  %p711_p9 = scmp.lt.u32.totalorder %s894_s14, %s943_s4 }
 0x20e   : > { %p712_p10 = scmp.lt.u32.totalorder %s710_s5, %s706_s28  ;;  %p714_p12 = scmp.lt.u32.totalorder %s706_s28, %s894_s14 }
 0x20f   : > { %p708_p7 = pnand %p707_p4, %p823_p5 }
 0x210   : > { %p713_p11 = por %p712_p10, %p711_p9 }
 0x211   : > { %p709_p8 = pneg %p708_p7 }
 0x212   : > { %p715_p13 = por %p714_p12, %p713_p11 }
 0x214   : > { %p716_p0 = pnand %p715_p13, %p709_p8 }
 0x216   : > { %719 = shalt.err (!%p716_p0)
}
 0x217   : > { %626 = dma.vmem_to_hbm [thread:$0]  (%p823_p5), %s896_s11, 256, %s894_s14, %s527_s19  }
 0x218 PF: > { %p632_p1 = scmp.ge.s32.totalorder %s754_s18, 2  ;;  %s553_s8 = sand.u32 1, %s742_s15  }
 0x219   : > { %s554_s9 = scalar_lea.sflag [#allocation3], %s553_s8 }
 0x21a   : > { %p629_p2 = pnand %p632_p1, %p827_p6 }
 0x21c   : > { %737 = dma.done.wait (!%p629_p2), %s554_s9, 256  }
 0x21d   : > { %739 = vsyncadd (!%p629_p2), %s554_s9, 4294967040  ;;  %p14_p3 = scmp.ge.s32.totalorder %s810_s21, 4   ;;  %s946_s15 = smov %s746_s16 }
 0x21e   : > { %s947_s16 = smov %s750_s17  ;;  %s948_s17 = smov %s821_s24 }
 0x21f   : > { %s949_s18 = smov %s810_s21  ;;  %16 = sbr.rel (!%p14_p3) target bundleno = 3 (0x3), region = 71 }
 0x226   :  { %559 = vsyncpa [#allocation3], 1 }
 0x227   :  { %561 = vsyncpa [#allocation3 + $0x1], 1 }

</bundles_post_ra>
